<compile_context>
chip_gen: v7x
topology: tpu7x:2x2x1
jax: 0.10.0
libtpu: 0.0.40
codegen_flags: <defaults>
</compile_context>

<pallas_src>
import functools
import numpy as np
import jax
import jax.numpy as jnp
from jax.experimental import pallas as pl
from jax.experimental.pallas import tpu as pltpu

try:
    from scipy.optimize import linear_sum_assignment as _scipy_lsa
except Exception:  # scipy not installed in this environment
    _scipy_lsa = None


def _round_up(x, m):
    return (x + m - 1) // m * m


def _pick_block(total, cap, unit):
    """Largest multiple of `unit` that divides `total` and is <= cap."""
    b = min(cap, total)
    b -= b % unit
    while b > unit:
        if total % b == 0:
            return b
        b -= unit
    return unit


def _vmem_limit_bytes():
    # Per-generation scoped-VMEM budget (half of physical, capped at 64 MiB);
    # falls back to the compiler default if the query is unavailable.
    try:
        cap = int(pltpu.get_tpu_info().vmem_capacity_bytes)
        return min(cap // 2, 64 << 20)
    except Exception:
        return None


# ----------------------------------------------------------------------------
# Pallas kernel: one (pred-block x target-block) tile of the fused,
# lambda-weighted pairwise matching cost.
# ----------------------------------------------------------------------------
def _combined_cost_kernel(p_ref, tT_ref, cost_ref, *, num_cls,
                          cls_lambda, iou_lambda, l1_lambda, angle_lambda):
    p = p_ref[...]        # (TQP, 7+C)  preds, feature-minor
    tT = tT_ref[...]      # (9,  TQT)   targets, transposed (query axis lane-dense)
    C = num_cls
    eps = jnp.float32(1e-7)

    # ---- narrow-axis precompute: O(TQP)+O(TQT), kept off the full tile ----
    pc = [p[:, d:d + 1] for d in range(3)]                # (TQP,1) pred centers
    ps = [p[:, 3 + d:4 + d] for d in range(3)]            # (TQP,1) pred sizes
    tc = [tT[1 + d:2 + d, :] for d in range(3)]           # (1,TQT) tgt centers
    ts = [tT[4 + d:5 + d, :] for d in range(3)]           # (1,TQT) tgt sizes
    pmin = [pc[d] - 0.5 * ps[d] for d in range(3)]
    pmax = [pc[d] + 0.5 * ps[d] for d in range(3)]
    tmin = [tc[d] - 0.5 * ts[d] for d in range(3)]
    tmax = [tc[d] + 0.5 * ts[d] for d in range(3)]
    pvol = ps[0] * ps[1] * ps[2]                           # (TQP,1)
    tvol = ts[0] * ts[1] * ts[2]                           # (1,TQT)

    pa = p[:, 6:7]                                         # (TQP,1) pred angle
    ta = tT[7:8, :]                                        # (1,TQT) target angle
    cos_p, sin_p = jnp.cos(pa), jnp.sin(pa)                # narrow transcendentals
    cos_t, sin_t = jnp.cos(ta), jnp.sin(ta)

    logits = p[:, 7:7 + C]                                 # (TQP,C)
    z = logits - jnp.max(logits, axis=-1, keepdims=True)
    ez = jnp.exp(z)
    probs = ez / jnp.sum(ez, axis=-1, keepdims=True)       # exact f32 softmax (narrow)
    neg_probs = probs * jnp.float32(-cls_lambda)           # fold cls_lambda (narrow)
    tcls = tT[8:9, :]                                      # (1,TQT) class ids (float)

    # ---- full-tile pairwise work (implicit (TQP,1)x(1,TQT) broadcasting) ----
    inter = cdist2 = enc2 = l1 = vshape = None
    for d in range(3):
        inter_d = jnp.maximum(
            jnp.minimum(pmax[d], tmax[d]) - jnp.maximum(pmin[d], tmin[d]), 0.0)
        inter = inter_d if inter is None else inter * inter_d
        enc_d = jnp.maximum(pmax[d], tmax[d]) - jnp.minimum(pmin[d], tmin[d])
        enc2 = enc_d * enc_d if enc2 is None else enc2 + enc_d * enc_d
        cd = pc[d] - tc[d]
        cdist2 = cd * cd if cdist2 is None else cdist2 + cd * cd
        sd = ps[d] - ts[d]
        l1_d = jnp.abs(cd) + jnp.abs(sd)
        l1 = l1_d if l1 is None else l1 + l1_d
        # r = (ps - ts) / (ps + ts + eps): approx reciprocal -> EUP slot.
        r = sd * pl.reciprocal((ps[d] + eps) + ts[d], approx=True)
        vshape = r * r if vshape is None else vshape + r * r
    vshape = vshape * jnp.float32(1.0 / 3.0)

    union = (pvol + eps) + tvol - inter
    iou = inter * pl.reciprocal(union, approx=True)
    dterm = cdist2 * pl.reciprocal(enc2 + eps, approx=True)
    alpha = vshape * pl.reciprocal((jnp.float32(1.0) - iou) + (vshape + eps),
                                   approx=True)
    ciou_loss = (1.0 - iou) + dterm + alpha * vshape        # 1 - CIoU
    cos_diff = cos_p * cos_t + sin_p * sin_t                # cos(angle_p - angle_t)
    ang_loss = 0.5 * (1.0 - cos_diff)

    cost = (iou_lambda * ciou_loss
            + (l1_lambda / 6.0) * l1
            + angle_lambda * ang_loss)

    # class matching cost: -cls_lambda * softmax(pred_logits)[:, target_cls]
    if C <= 8:
        # VPU compare-and-select gather (2 full-tile ops per class).
        for c in range(C):
            sel = (tcls == jnp.float32(c)).astype(jnp.float32)   # (1,TQT)
            cost = cost + sel * neg_probs[:, c:c + 1]
    else:
        # One-hot built on the narrow (C,TQT) tile, contracted on the MXU.
        onehot = (jax.lax.broadcasted_iota(jnp.float32, (C, tcls.shape[-1]), 0)
                  == tcls).astype(jnp.float32)
        cost = cost + jnp.dot(neg_probs, onehot,
                              preferred_element_type=jnp.float32)

    cost_ref[...] = cost


def pairwise_combined_cost(preds, targets, *, cls_lambda, iou_lambda,
                           l1_lambda, angle_lambda):
    """Fused lambda-weighted matching cost, PADDED (N, Qp, Qt) f32.

    The padded rows/columns are sliced off on the host before Hungarian."""
    N, Q, Dp = preds.shape
    Dt = targets.shape[-1]
    C = Dp - 7

    Qp = _round_up(Q, 8)      # pred (sublane) axis
    Qt = _round_up(Q, 128)    # target (lane) axis -> lane-dense stores
    tqp = _pick_block(Qp, 256, 8)
    tqt = _pick_block(Qt, 512, 128)

    preds_p = jnp.zeros((N, Qp, Dp), jnp.float32)
    preds_p = preds_p.at[:, :Q, :].set(preds.astype(jnp.float32))
    t_t = jnp.swapaxes(targets.astype(jnp.float32), 1, 2)          # (N, Dt, Q)
    targets_p = jnp.zeros((N, Dt, Qt), jnp.float32)
    targets_p = targets_p.at[:, :, :Q].set(t_t)

    kern = functools.partial(_combined_cost_kernel, num_cls=C,
                             cls_lambda=float(cls_lambda),
                             iou_lambda=float(iou_lambda),
                             l1_lambda=float(l1_lambda),
                             angle_lambda=float(angle_lambda))
    cost = pl.pallas_call(
        kern,
        out_shape=jax.ShapeDtypeStruct((N, Qp, Qt), jnp.float32),
        grid=(N, Qp // tqp, Qt // tqt),
        in_specs=[
            pl.BlockSpec((None, tqp, Dp), lambda n, i, j: (n, i, 0)),
            pl.BlockSpec((None, Dt, tqt), lambda n, i, j: (n, 0, j)),
        ],
        out_specs=pl.BlockSpec((None, tqp, tqt), lambda n, i, j: (n, i, j)),
        compiler_params=pltpu.CompilerParams(
            dimension_semantics=("parallel", "parallel", "parallel"),
            vmem_limit_bytes=_vmem_limit_bytes()),
    )(preds_p, targets_p)
    return cost


# ----------------------------------------------------------------------------
# On-device matched-pair losses (take_along_axis over the (N,Q) assignment).
# ----------------------------------------------------------------------------
def _matched_losses(preds, targets, target_idx, *, cls_lambda, iou_lambda,
                    l1_lambda, angle_lambda):
    preds = preds.astype(jnp.float32)
    targets = targets.astype(jnp.float32)
    eps = 1e-7

    mt = jnp.take_along_axis(targets, target_idx[:, :, None], axis=1)  # (N,Q,Dt)
    track_ids = mt[:, :, 0]
    pred_track_mask = track_ids != -999.0
    # PyTorch gates box/angle losses with pred_track_mask[:, None, :], i.e. the
    # mask is applied along the TARGET axis of the (pred, target) cost matrix.
    # For the matched pair (q, target_idx[q]) that makes the gate value
    # pred_track_mask[b, target_idx[b, q]] (a second application of target_idx);
    # reproduced verbatim here.
    gate = jnp.take_along_axis(pred_track_mask, target_idx, axis=1)

    pc, ps = preds[:, :, 0:3], preds[:, :, 3:6]
    tc, ts = mt[:, :, 1:4], mt[:, :, 4:7]
    pmin, pmax = pc - 0.5 * ps, pc + 0.5 * ps
    tmin, tmax = tc - 0.5 * ts, tc + 0.5 * ts
    inter = jnp.prod(jnp.maximum(
        jnp.minimum(pmax, tmax) - jnp.maximum(pmin, tmin), 0.0), axis=-1)
    enc = jnp.maximum(pmax, tmax) - jnp.minimum(pmin, tmin)
    enc2 = jnp.sum(enc * enc, axis=-1)
    cdist2 = jnp.sum((pc - tc) ** 2, axis=-1)
    r = (ps - ts) / (ps + ts + eps)
    vshape = jnp.sum(r * r, axis=-1) / 3.0
    pvol = jnp.prod(ps, axis=-1)
    tvol = jnp.prod(ts, axis=-1)
    union = pvol + tvol - inter
    iou = inter / (union + eps)
    alpha = vshape / (1.0 - iou + vshape + eps)
    ciou_q = 1.0 - (iou - cdist2 / (enc2 + eps) - alpha * vshape)
    l1_q = jnp.mean(jnp.abs(preds[:, :, 0:6] - mt[:, :, 1:7]), axis=-1)
    ang_q = (1.0 - jnp.cos(preds[:, :, 6] - mt[:, :, 7])) * 0.5

    logp = jax.nn.log_softmax(preds[:, :, 7:], axis=-1)
    tcls = mt[:, :, 8].astype(jnp.int32)
    cls_q = -jnp.take_along_axis(logp, tcls[:, :, None], axis=-1)[..., 0]

    cls_loss = jnp.mean(cls_q)                       # ignore_bg_cls=False path
    gate_f = gate.astype(jnp.float32)
    cnt = jnp.maximum(jnp.sum(gate_f), 1.0)          # guard: no valid tracks -> 0, not NaN
    gmean = lambda x: jnp.sum(x * gate_f) / cnt
    loss = (cls_lambda * cls_loss + iou_lambda * gmean(ciou_q)
            + l1_lambda * gmean(l1_q) + angle_lambda * gmean(ang_q))
    return loss, track_ids, pred_track_mask


# ----------------------------------------------------------------------------
# Host-side exact minimum-cost assignment
# ----------------------------------------------------------------------------
def _hungarian_min(cost):
    """Pure-Python O(n^3) Jonker-Volgenant fallback (used only without scipy)."""
    cost = np.asarray(cost, dtype=np.float64)
    n = cost.shape[0]
    INF = 1e18
    u = np.zeros(n + 1)
    v = np.zeros(n + 1)
    p = np.zeros(n + 1, dtype=np.int64)
    way = np.zeros(n + 1, dtype=np.int64)
    for i in range(1, n + 1):
        p[0] = i
        j0 = 0
        minv = np.full(n + 1, INF)
        used = np.zeros(n + 1, dtype=bool)
        while True:
            used[j0] = True
            i0 = p[j0]
            delta = INF
            j1 = 0
            for j in range(1, n + 1):
                if not used[j]:
                    cur = cost[i0 - 1, j - 1] - u[i0] - v[j]
                    if cur < minv[j]:
                        minv[j] = cur
                        way[j] = j0
                    if minv[j] < delta:
                        delta = minv[j]
                        j1 = j
            for j in range(n + 1):
                if used[j]:
                    u[p[j]] += delta
                    v[j] -= delta
                else:
                    minv[j] -= delta
            j0 = j1
            if p[j0] == 0:
                break
        while j0 != 0:
            j1 = way[j0]
            p[j0] = p[j1]
            j0 = j1
    row_to_col = np.zeros(n, dtype=np.int64)
    for j in range(1, n + 1):
        if p[j] > 0:
            row_to_col[p[j] - 1] = j - 1
    return row_to_col


def _assign_min_cost(cost_b):
    if _scipy_lsa is not None:
        row, col = _scipy_lsa(cost_b)
        out = np.zeros(cost_b.shape[0], dtype=np.int64)
        out[row] = col
        return out
    return _hungarian_min(cost_b)


# ----------------------------------------------------------------------------
# TrackLoss (first-frame path)
# ----------------------------------------------------------------------------
class TrackLossPallas:
    def __init__(self, cls_lambda, iou_lambda, l1_lambda, angle_lambda):
        lam = dict(cls_lambda=float(cls_lambda), iou_lambda=float(iou_lambda),
                   l1_lambda=float(l1_lambda), angle_lambda=float(angle_lambda))
        self._cost_fn = jax.jit(functools.partial(pairwise_combined_cost, **lam))
        self._matched_fn = jax.jit(functools.partial(_matched_losses, **lam))

    def __call__(self, preds, targets, ego_preds=None, ego_targets=None,
                 prev_track_ids=None):
        # TODO(synk): next-frame branch (prev_track_ids) and the ego-loss branch
        # use data-dependent boolean gather/scatter + a second Hungarian pass;
        # only the first-frame matching path is ported here.
        assert prev_track_ids is None and ego_preds is None and ego_targets is None
        return self._first_frame_forward(preds, targets)

    def _first_frame_forward(self, preds, targets):
        N, Q, _ = preds.shape

        # Fused combined pairwise cost (padded, lane-dense target axis); this is
        # the ONLY (N,Q,Q)-sized array that ever leaves the device.
        costs = self._cost_fn(preds, targets)
        costs_np = np.asarray(jax.device_get(costs))[:, :Q, :Q]
        target_idx_np = np.stack(
            [_assign_min_cost(costs_np[b]) for b in range(N)], axis=0)  # (N, Q)
        target_idx = jnp.asarray(target_idx_np, dtype=jnp.int32)
        pred_idx = jnp.tile(jnp.arange(Q, dtype=jnp.int32)[None, :], (N, 1))

        # Matched-pair losses + masked means computed on device.
        loss, track_ids, pred_track_mask = self._matched_fn(
            preds, targets, target_idx)

        return (loss.astype(jnp.float32), pred_idx, target_idx,
                track_ids.astype(jnp.float32), pred_track_mask)


# ----------------------------------------------------------------------------
if __name__ == "__main__":
    N, Q, C = 2, 8, 4          # batch, num_dets, num classes
    key = jax.random.PRNGKey(0)
    ks = jax.random.split(key, 8)

    p_center = jax.random.uniform(ks[0], (N, Q, 3), minval=-2.0, maxval=2.0)
    p_size = jax.random.uniform(ks[1], (N, Q, 3), minval=0.5, maxval=2.0)
    p_angle = jax.random.uniform(ks[2], (N, Q, 1), minval=-3.1, maxval=3.1)
    p_logits = jax.random.normal(ks[3], (N, Q, C))
    preds = jnp.concatenate([p_center, p_size, p_angle, p_logits],
                            axis=-1).astype(jnp.float32)          # (N, Q, 11)

    t_ids = jnp.arange(N * Q, dtype=jnp.float32).reshape(N, Q)
    t_ids = t_ids.at[0, 6].set(-999.0).at[1, 7].set(-999.0)        # some bg slots
    t_center = jax.random.uniform(ks[4], (N, Q, 3), minval=-2.0, maxval=2.0)
    t_size = jax.random.uniform(ks[5], (N, Q, 3), minval=0.5, maxval=2.0)
    t_angle = jax.random.uniform(ks[6], (N, Q, 1), minval=-3.1, maxval=3.1)
    t_cls = jax.random.randint(ks[7], (N, Q, 1), 0, C).astype(jnp.float32)
    targets = jnp.concatenate([t_ids[..., None], t_center, t_size,
                               t_angle, t_cls], axis=-1).astype(jnp.float32)  # (N, Q, 9)

    loss_fn = TrackLossPallas(cls_lambda=1.0, iou_lambda=2.0,
                              l1_lambda=5.0, angle_lambda=1.0)

    loss, pred_indexes, target_indexes, track_ids, pred_track_mask = loss_fn(
        preds, targets)
    jax.block_until_ready(loss)
    jax.block_until_ready(pred_track_mask)
    print("KERNEL_OK")
</pallas_src>

<mosaic_0001>
module attributes {stable_mosaic.version = 11 : i64} {
  func.func @_combined_cost_kernel(%arg0: i32, %arg1: i32, %arg2: i32, %arg3: memref<1x8x11xf32, #tpu.memory_space<vmem>>, %arg4: memref<1x9x128xf32, #tpu.memory_space<vmem>>, %arg5: memref<1x8x128xf32, #tpu.memory_space<vmem>>) attributes {dimension_semantics = [#tpu.dimension_semantics<parallel>, #tpu.dimension_semantics<parallel>, #tpu.dimension_semantics<parallel>], iteration_bounds = array<i64: 2, 1, 1>, scalar_prefetch = 0 : i64, scratch_operands = 0 : i64, tpu.core_type = #tpu.core_type<tc>, window_params = [{transform_indices = @transform_0, window_bounds = array<i64: 1, 8, 11>}, {transform_indices = @transform_1, window_bounds = array<i64: 1, 9, 128>}, {transform_indices = @transform_2, window_bounds = array<i64: 1, 8, 128>}]} {
    %c0 = arith.constant 0 : index
    %c0_0 = arith.constant 0 : index
    %c0_1 = arith.constant 0 : index
    %0 = vector.load %arg3[%c0, %c0_0, %c0_1] : memref<1x8x11xf32, #tpu.memory_space<vmem>>, vector<1x8x11xf32>
    %1 = vector.shape_cast %0 : vector<1x8x11xf32> to vector<8x11xf32>
    %c0_2 = arith.constant 0 : index
    %c0_3 = arith.constant 0 : index
    %c0_4 = arith.constant 0 : index
    %2 = vector.load %arg4[%c0_2, %c0_3, %c0_4] : memref<1x9x128xf32, #tpu.memory_space<vmem>>, vector<1x9x128xf32>
    %3 = vector.shape_cast %2 : vector<1x9x128xf32> to vector<9x128xf32>
    %4 = vector.extract_strided_slice %1 {offsets = [0, 0], sizes = [8, 1], strides = [1, 1]} : vector<8x11xf32> to vector<8x1xf32>
    %5 = vector.extract_strided_slice %1 {offsets = [0, 1], sizes = [8, 1], strides = [1, 1]} : vector<8x11xf32> to vector<8x1xf32>
    %6 = vector.extract_strided_slice %1 {offsets = [0, 2], sizes = [8, 1], strides = [1, 1]} : vector<8x11xf32> to vector<8x1xf32>
    %7 = vector.extract_strided_slice %1 {offsets = [0, 3], sizes = [8, 1], strides = [1, 1]} : vector<8x11xf32> to vector<8x1xf32>
    %8 = vector.extract_strided_slice %1 {offsets = [0, 4], sizes = [8, 1], strides = [1, 1]} : vector<8x11xf32> to vector<8x1xf32>
    %9 = vector.extract_strided_slice %1 {offsets = [0, 5], sizes = [8, 1], strides = [1, 1]} : vector<8x11xf32> to vector<8x1xf32>
    %10 = vector.extract_strided_slice %3 {offsets = [1, 0], sizes = [1, 128], strides = [1, 1]} : vector<9x128xf32> to vector<1x128xf32>
    %11 = vector.extract_strided_slice %3 {offsets = [2, 0], sizes = [1, 128], strides = [1, 1]} : vector<9x128xf32> to vector<1x128xf32>
    %12 = vector.extract_strided_slice %3 {offsets = [3, 0], sizes = [1, 128], strides = [1, 1]} : vector<9x128xf32> to vector<1x128xf32>
    %13 = vector.extract_strided_slice %3 {offsets = [4, 0], sizes = [1, 128], strides = [1, 1]} : vector<9x128xf32> to vector<1x128xf32>
    %14 = vector.extract_strided_slice %3 {offsets = [5, 0], sizes = [1, 128], strides = [1, 1]} : vector<9x128xf32> to vector<1x128xf32>
    %15 = vector.extract_strided_slice %3 {offsets = [6, 0], sizes = [1, 128], strides = [1, 1]} : vector<9x128xf32> to vector<1x128xf32>
    %cst = arith.constant 5.000000e-01 : f32
    %16 = vector.broadcast %cst : f32 to vector<8x1xf32>
    %17 = arith.mulf %16, %7 : vector<8x1xf32>
    %18 = arith.subf %4, %17 : vector<8x1xf32>
    %cst_5 = arith.constant 5.000000e-01 : f32
    %19 = vector.broadcast %cst_5 : f32 to vector<8x1xf32>
    %20 = arith.mulf %19, %8 : vector<8x1xf32>
    %21 = arith.subf %5, %20 : vector<8x1xf32>
    %cst_6 = arith.constant 5.000000e-01 : f32
    %22 = vector.broadcast %cst_6 : f32 to vector<8x1xf32>
    %23 = arith.mulf %22, %9 : vector<8x1xf32>
    %24 = arith.subf %6, %23 : vector<8x1xf32>
    %cst_7 = arith.constant 5.000000e-01 : f32
    %25 = vector.broadcast %cst_7 : f32 to vector<8x1xf32>
    %26 = arith.mulf %25, %7 : vector<8x1xf32>
    %27 = arith.addf %4, %26 : vector<8x1xf32>
    %cst_8 = arith.constant 5.000000e-01 : f32
    %28 = vector.broadcast %cst_8 : f32 to vector<8x1xf32>
    %29 = arith.mulf %28, %8 : vector<8x1xf32>
    %30 = arith.addf %5, %29 : vector<8x1xf32>
    %cst_9 = arith.constant 5.000000e-01 : f32
    %31 = vector.broadcast %cst_9 : f32 to vector<8x1xf32>
    %32 = arith.mulf %31, %9 : vector<8x1xf32>
    %33 = arith.addf %6, %32 : vector<8x1xf32>
    %cst_10 = arith.constant 5.000000e-01 : f32
    %34 = vector.broadcast %cst_10 : f32 to vector<1x128xf32>
    %35 = arith.mulf %34, %13 : vector<1x128xf32>
    %36 = arith.subf %10, %35 : vector<1x128xf32>
    %cst_11 = arith.constant 5.000000e-01 : f32
    %37 = vector.broadcast %cst_11 : f32 to vector<1x128xf32>
    %38 = arith.mulf %37, %14 : vector<1x128xf32>
    %39 = arith.subf %11, %38 : vector<1x128xf32>
    %cst_12 = arith.constant 5.000000e-01 : f32
    %40 = vector.broadcast %cst_12 : f32 to vector<1x128xf32>
    %41 = arith.mulf %40, %15 : vector<1x128xf32>
    %42 = arith.subf %12, %41 : vector<1x128xf32>
    %cst_13 = arith.constant 5.000000e-01 : f32
    %43 = vector.broadcast %cst_13 : f32 to vector<1x128xf32>
    %44 = arith.mulf %43, %13 : vector<1x128xf32>
    %45 = arith.addf %10, %44 : vector<1x128xf32>
    %cst_14 = arith.constant 5.000000e-01 : f32
    %46 = vector.broadcast %cst_14 : f32 to vector<1x128xf32>
    %47 = arith.mulf %46, %14 : vector<1x128xf32>
    %48 = arith.addf %11, %47 : vector<1x128xf32>
    %cst_15 = arith.constant 5.000000e-01 : f32
    %49 = vector.broadcast %cst_15 : f32 to vector<1x128xf32>
    %50 = arith.mulf %49, %15 : vector<1x128xf32>
    %51 = arith.addf %12, %50 : vector<1x128xf32>
    %52 = arith.mulf %7, %8 : vector<8x1xf32>
    %53 = arith.mulf %52, %9 : vector<8x1xf32>
    %54 = arith.mulf %13, %14 : vector<1x128xf32>
    %55 = arith.mulf %54, %15 : vector<1x128xf32>
    %56 = vector.extract_strided_slice %1 {offsets = [0, 6], sizes = [8, 1], strides = [1, 1]} : vector<8x11xf32> to vector<8x1xf32>
    %57 = vector.extract_strided_slice %3 {offsets = [7, 0], sizes = [1, 128], strides = [1, 1]} : vector<9x128xf32> to vector<1x128xf32>
    %58 = math.cos %56 : vector<8x1xf32>
    %59 = math.sin %56 : vector<8x1xf32>
    %60 = math.cos %57 : vector<1x128xf32>
    %61 = math.sin %57 : vector<1x128xf32>
    %62 = vector.extract_strided_slice %1 {offsets = [0, 7], sizes = [8, 4], strides = [1, 1]} : vector<8x11xf32> to vector<8x4xf32>
    %cst_16 = arith.constant dense<0xFF800000> : vector<8xf32>
    %63 = vector.multi_reduction <maximumf>, %62, %cst_16 [1] : vector<8x4xf32> to vector<8xf32>
    %64 = vector.shape_cast %63 : vector<8xf32> to vector<8x1xf32>
    %65 = vector.broadcast %64 : vector<8x1xf32> to vector<8x4xf32>
    %66 = arith.subf %62, %65 : vector<8x4xf32>
    %67 = math.exp %66 : vector<8x4xf32>
    %cst_17 = arith.constant dense<0.000000e+00> : vector<8xf32>
    %68 = vector.multi_reduction <add>, %67, %cst_17 [1] : vector<8x4xf32> to vector<8xf32>
    %69 = vector.shape_cast %68 : vector<8xf32> to vector<8x1xf32>
    %70 = vector.broadcast %69 : vector<8x1xf32> to vector<8x4xf32>
    %71 = arith.divf %67, %70 : vector<8x4xf32>
    %cst_18 = arith.constant -1.000000e+00 : f32
    %72 = vector.broadcast %cst_18 : f32 to vector<8x4xf32>
    %73 = arith.mulf %71, %72 : vector<8x4xf32>
    %74 = vector.extract_strided_slice %3 {offsets = [8, 0], sizes = [1, 128], strides = [1, 1]} : vector<9x128xf32> to vector<1x128xf32>
    %75 = vector.broadcast %27 : vector<8x1xf32> to vector<8x128xf32>
    %76 = vector.broadcast %45 : vector<1x128xf32> to vector<8x128xf32>
    %77 = arith.minimumf %75, %76 : vector<8x128xf32>
    %78 = vector.broadcast %18 : vector<8x1xf32> to vector<8x128xf32>
    %79 = vector.broadcast %36 : vector<1x128xf32> to vector<8x128xf32>
    %80 = arith.maximumf %78, %79 : vector<8x128xf32>
    %81 = arith.subf %77, %80 : vector<8x128xf32>
    %cst_19 = arith.constant 0.000000e+00 : f32
    %82 = vector.broadcast %cst_19 : f32 to vector<8x128xf32>
    %83 = arith.maximumf %81, %82 : vector<8x128xf32>
    %84 = vector.broadcast %27 : vector<8x1xf32> to vector<8x128xf32>
    %85 = vector.broadcast %45 : vector<1x128xf32> to vector<8x128xf32>
    %86 = arith.maximumf %84, %85 : vector<8x128xf32>
    %87 = vector.broadcast %18 : vector<8x1xf32> to vector<8x128xf32>
    %88 = vector.broadcast %36 : vector<1x128xf32> to vector<8x128xf32>
    %89 = arith.minimumf %87, %88 : vector<8x128xf32>
    %90 = arith.subf %86, %89 : vector<8x128xf32>
    %91 = arith.mulf %90, %90 : vector<8x128xf32>
    %92 = vector.broadcast %4 : vector<8x1xf32> to vector<8x128xf32>
    %93 = vector.broadcast %10 : vector<1x128xf32> to vector<8x128xf32>
    %94 = arith.subf %92, %93 : vector<8x128xf32>
    %95 = arith.mulf %94, %94 : vector<8x128xf32>
    %96 = vector.broadcast %7 : vector<8x1xf32> to vector<8x128xf32>
    %97 = vector.broadcast %13 : vector<1x128xf32> to vector<8x128xf32>
    %98 = arith.subf %96, %97 : vector<8x128xf32>
    %99 = math.absf %94 : vector<8x128xf32>
    %100 = math.absf %98 : vector<8x128xf32>
    %101 = arith.addf %99, %100 : vector<8x128xf32>
    %cst_20 = arith.constant 1.000000e-07 : f32
    %102 = vector.broadcast %cst_20 : f32 to vector<8x1xf32>
    %103 = arith.addf %7, %102 : vector<8x1xf32>
    %104 = vector.broadcast %103 : vector<8x1xf32> to vector<8x128xf32>
    %105 = vector.broadcast %13 : vector<1x128xf32> to vector<8x128xf32>
    %106 = arith.addf %104, %105 : vector<8x128xf32>
    %107 = tpu.reciprocal %106 {approx = true} : vector<8x128xf32> -> vector<8x128xf32>
    %108 = arith.mulf %98, %107 : vector<8x128xf32>
    %109 = arith.mulf %108, %108 : vector<8x128xf32>
    %110 = vector.broadcast %30 : vector<8x1xf32> to vector<8x128xf32>
    %111 = vector.broadcast %48 : vector<1x128xf32> to vector<8x128xf32>
    %112 = arith.minimumf %110, %111 : vector<8x128xf32>
    %113 = vector.broadcast %21 : vector<8x1xf32> to vector<8x128xf32>
    %114 = vector.broadcast %39 : vector<1x128xf32> to vector<8x128xf32>
    %115 = arith.maximumf %113, %114 : vector<8x128xf32>
    %116 = arith.subf %112, %115 : vector<8x128xf32>
    %cst_21 = arith.constant 0.000000e+00 : f32
    %117 = vector.broadcast %cst_21 : f32 to vector<8x128xf32>
    %118 = arith.maximumf %116, %117 : vector<8x128xf32>
    %119 = arith.mulf %83, %118 : vector<8x128xf32>
    %120 = vector.broadcast %30 : vector<8x1xf32> to vector<8x128xf32>
    %121 = vector.broadcast %48 : vector<1x128xf32> to vector<8x128xf32>
    %122 = arith.maximumf %120, %121 : vector<8x128xf32>
    %123 = vector.broadcast %21 : vector<8x1xf32> to vector<8x128xf32>
    %124 = vector.broadcast %39 : vector<1x128xf32> to vector<8x128xf32>
    %125 = arith.minimumf %123, %124 : vector<8x128xf32>
    %126 = arith.subf %122, %125 : vector<8x128xf32>
    %127 = arith.mulf %126, %126 : vector<8x128xf32>
    %128 = arith.addf %91, %127 : vector<8x128xf32>
    %129 = vector.broadcast %5 : vector<8x1xf32> to vector<8x128xf32>
    %130 = vector.broadcast %11 : vector<1x128xf32> to vector<8x128xf32>
    %131 = arith.subf %129, %130 : vector<8x128xf32>
    %132 = arith.mulf %131, %131 : vector<8x128xf32>
    %133 = arith.addf %95, %132 : vector<8x128xf32>
    %134 = vector.broadcast %8 : vector<8x1xf32> to vector<8x128xf32>
    %135 = vector.broadcast %14 : vector<1x128xf32> to vector<8x128xf32>
    %136 = arith.subf %134, %135 : vector<8x128xf32>
    %137 = math.absf %131 : vector<8x128xf32>
    %138 = math.absf %136 : vector<8x128xf32>
    %139 = arith.addf %137, %138 : vector<8x128xf32>
    %140 = arith.addf %101, %139 : vector<8x128xf32>
    %cst_22 = arith.constant 1.000000e-07 : f32
    %141 = vector.broadcast %cst_22 : f32 to vector<8x1xf32>
    %142 = arith.addf %8, %141 : vector<8x1xf32>
    %143 = vector.broadcast %142 : vector<8x1xf32> to vector<8x128xf32>
    %144 = vector.broadcast %14 : vector<1x128xf32> to vector<8x128xf32>
    %145 = arith.addf %143, %144 : vector<8x128xf32>
    %146 = tpu.reciprocal %145 {approx = true} : vector<8x128xf32> -> vector<8x128xf32>
    %147 = arith.mulf %136, %146 : vector<8x128xf32>
    %148 = arith.mulf %147, %147 : vector<8x128xf32>
    %149 = arith.addf %109, %148 : vector<8x128xf32>
    %150 = vector.broadcast %33 : vector<8x1xf32> to vector<8x128xf32>
    %151 = vector.broadcast %51 : vector<1x128xf32> to vector<8x128xf32>
    %152 = arith.minimumf %150, %151 : vector<8x128xf32>
    %153 = vector.broadcast %24 : vector<8x1xf32> to vector<8x128xf32>
    %154 = vector.broadcast %42 : vector<1x128xf32> to vector<8x128xf32>
    %155 = arith.maximumf %153, %154 : vector<8x128xf32>
    %156 = arith.subf %152, %155 : vector<8x128xf32>
    %cst_23 = arith.constant 0.000000e+00 : f32
    %157 = vector.broadcast %cst_23 : f32 to vector<8x128xf32>
    %158 = arith.maximumf %156, %157 : vector<8x128xf32>
    %159 = arith.mulf %119, %158 : vector<8x128xf32>
    %160 = vector.broadcast %33 : vector<8x1xf32> to vector<8x128xf32>
    %161 = vector.broadcast %51 : vector<1x128xf32> to vector<8x128xf32>
    %162 = arith.maximumf %160, %161 : vector<8x128xf32>
    %163 = vector.broadcast %24 : vector<8x1xf32> to vector<8x128xf32>
    %164 = vector.broadcast %42 : vector<1x128xf32> to vector<8x128xf32>
    %165 = arith.minimumf %163, %164 : vector<8x128xf32>
    %166 = arith.subf %162, %165 : vector<8x128xf32>
    %167 = arith.mulf %166, %166 : vector<8x128xf32>
    %168 = arith.addf %128, %167 : vector<8x128xf32>
    %169 = vector.broadcast %6 : vector<8x1xf32> to vector<8x128xf32>
    %170 = vector.broadcast %12 : vector<1x128xf32> to vector<8x128xf32>
    %171 = arith.subf %169, %170 : vector<8x128xf32>
    %172 = arith.mulf %171, %171 : vector<8x128xf32>
    %173 = arith.addf %133, %172 : vector<8x128xf32>
    %174 = vector.broadcast %9 : vector<8x1xf32> to vector<8x128xf32>
    %175 = vector.broadcast %15 : vector<1x128xf32> to vector<8x128xf32>
    %176 = arith.subf %174, %175 : vector<8x128xf32>
    %177 = math.absf %171 : vector<8x128xf32>
    %178 = math.absf %176 : vector<8x128xf32>
    %179 = arith.addf %177, %178 : vector<8x128xf32>
    %180 = arith.addf %140, %179 : vector<8x128xf32>
    %cst_24 = arith.constant 1.000000e-07 : f32
    %181 = vector.broadcast %cst_24 : f32 to vector<8x1xf32>
    %182 = arith.addf %9, %181 : vector<8x1xf32>
    %183 = vector.broadcast %182 : vector<8x1xf32> to vector<8x128xf32>
    %184 = vector.broadcast %15 : vector<1x128xf32> to vector<8x128xf32>
    %185 = arith.addf %183, %184 : vector<8x128xf32>
    %186 = tpu.reciprocal %185 {approx = true} : vector<8x128xf32> -> vector<8x128xf32>
    %187 = arith.mulf %176, %186 : vector<8x128xf32>
    %188 = arith.mulf %187, %187 : vector<8x128xf32>
    %189 = arith.addf %149, %188 : vector<8x128xf32>
    %cst_25 = arith.constant 0.333333343 : f32
    %190 = vector.broadcast %cst_25 : f32 to vector<8x128xf32>
    %191 = arith.mulf %189, %190 : vector<8x128xf32>
    %cst_26 = arith.constant 1.000000e-07 : f32
    %192 = vector.broadcast %cst_26 : f32 to vector<8x1xf32>
    %193 = arith.addf %53, %192 : vector<8x1xf32>
    %194 = vector.broadcast %193 : vector<8x1xf32> to vector<8x128xf32>
    %195 = vector.broadcast %55 : vector<1x128xf32> to vector<8x128xf32>
    %196 = arith.addf %194, %195 : vector<8x128xf32>
    %197 = arith.subf %196, %159 : vector<8x128xf32>
    %198 = tpu.reciprocal %197 {approx = true} : vector<8x128xf32> -> vector<8x128xf32>
    %199 = arith.mulf %159, %198 : vector<8x128xf32>
    %cst_27 = arith.constant 1.000000e-07 : f32
    %200 = vector.broadcast %cst_27 : f32 to vector<8x128xf32>
    %201 = arith.addf %168, %200 : vector<8x128xf32>
    %202 = tpu.reciprocal %201 {approx = true} : vector<8x128xf32> -> vector<8x128xf32>
    %203 = arith.mulf %173, %202 : vector<8x128xf32>
    %cst_28 = arith.constant 1.000000e+00 : f32
    %204 = vector.broadcast %cst_28 : f32 to vector<8x128xf32>
    %205 = arith.subf %204, %199 : vector<8x128xf32>
    %cst_29 = arith.constant 1.000000e-07 : f32
    %206 = vector.broadcast %cst_29 : f32 to vector<8x128xf32>
    %207 = arith.addf %191, %206 : vector<8x128xf32>
    %208 = arith.addf %205, %207 : vector<8x128xf32>
    %209 = tpu.reciprocal %208 {approx = true} : vector<8x128xf32> -> vector<8x128xf32>
    %210 = arith.mulf %191, %209 : vector<8x128xf32>
    %cst_30 = arith.constant 1.000000e+00 : f32
    %211 = vector.broadcast %cst_30 : f32 to vector<8x128xf32>
    %212 = arith.subf %211, %199 : vector<8x128xf32>
    %213 = arith.addf %212, %203 : vector<8x128xf32>
    %214 = arith.mulf %210, %191 : vector<8x128xf32>
    %215 = arith.addf %213, %214 : vector<8x128xf32>
    %216 = vector.broadcast %58 : vector<8x1xf32> to vector<8x128xf32>
    %217 = vector.broadcast %60 : vector<1x128xf32> to vector<8x128xf32>
    %218 = arith.mulf %216, %217 : vector<8x128xf32>
    %219 = vector.broadcast %59 : vector<8x1xf32> to vector<8x128xf32>
    %220 = vector.broadcast %61 : vector<1x128xf32> to vector<8x128xf32>
    %221 = arith.mulf %219, %220 : vector<8x128xf32>
    %222 = arith.addf %218, %221 : vector<8x128xf32>
    %cst_31 = arith.constant 1.000000e+00 : f32
    %223 = vector.broadcast %cst_31 : f32 to vector<8x128xf32>
    %224 = arith.subf %223, %222 : vector<8x128xf32>
    %cst_32 = arith.constant 5.000000e-01 : f32
    %225 = vector.broadcast %cst_32 : f32 to vector<8x128xf32>
    %226 = arith.mulf %225, %224 : vector<8x128xf32>
    %cst_33 = arith.constant 2.000000e+00 : f32
    %227 = vector.broadcast %cst_33 : f32 to vector<8x128xf32>
    %228 = arith.mulf %227, %215 : vector<8x128xf32>
    %cst_34 = arith.constant 0.833333313 : f32
    %229 = vector.broadcast %cst_34 : f32 to vector<8x128xf32>
    %230 = arith.mulf %229, %180 : vector<8x128xf32>
    %231 = arith.addf %228, %230 : vector<8x128xf32>
    %cst_35 = arith.constant 1.000000e+00 : f32
    %232 = vector.broadcast %cst_35 : f32 to vector<8x128xf32>
    %233 = arith.mulf %232, %226 : vector<8x128xf32>
    %234 = arith.addf %231, %233 : vector<8x128xf32>
    %cst_36 = arith.constant 0.000000e+00 : f32
    %235 = vector.broadcast %cst_36 : f32 to vector<1x128xf32>
    %236 = arith.cmpf oeq, %74, %235 : vector<1x128xf32>
    %237 = arith.extui %236 : vector<1x128xi1> to vector<1x128xi32>
    %238 = arith.sitofp %237 : vector<1x128xi32> to vector<1x128xf32>
    %239 = vector.extract_strided_slice %73 {offsets = [0, 0], sizes = [8, 1], strides = [1, 1]} : vector<8x4xf32> to vector<8x1xf32>
    %240 = vector.broadcast %238 : vector<1x128xf32> to vector<8x128xf32>
    %241 = vector.broadcast %239 : vector<8x1xf32> to vector<8x128xf32>
    %242 = arith.mulf %240, %241 : vector<8x128xf32>
    %243 = arith.addf %234, %242 : vector<8x128xf32>
    %cst_37 = arith.constant 1.000000e+00 : f32
    %244 = vector.broadcast %cst_37 : f32 to vector<1x128xf32>
    %245 = arith.cmpf oeq, %74, %244 : vector<1x128xf32>
    %246 = arith.extui %245 : vector<1x128xi1> to vector<1x128xi32>
    %247 = arith.sitofp %246 : vector<1x128xi32> to vector<1x128xf32>
    %248 = vector.extract_strided_slice %73 {offsets = [0, 1], sizes = [8, 1], strides = [1, 1]} : vector<8x4xf32> to vector<8x1xf32>
    %249 = vector.broadcast %247 : vector<1x128xf32> to vector<8x128xf32>
    %250 = vector.broadcast %248 : vector<8x1xf32> to vector<8x128xf32>
    %251 = arith.mulf %249, %250 : vector<8x128xf32>
    %252 = arith.addf %243, %251 : vector<8x128xf32>
    %cst_38 = arith.constant 2.000000e+00 : f32
    %253 = vector.broadcast %cst_38 : f32 to vector<1x128xf32>
    %254 = arith.cmpf oeq, %74, %253 : vector<1x128xf32>
    %255 = arith.extui %254 : vector<1x128xi1> to vector<1x128xi32>
    %256 = arith.sitofp %255 : vector<1x128xi32> to vector<1x128xf32>
    %257 = vector.extract_strided_slice %73 {offsets = [0, 2], sizes = [8, 1], strides = [1, 1]} : vector<8x4xf32> to vector<8x1xf32>
    %258 = vector.broadcast %256 : vector<1x128xf32> to vector<8x128xf32>
    %259 = vector.broadcast %257 : vector<8x1xf32> to vector<8x128xf32>
    %260 = arith.mulf %258, %259 : vector<8x128xf32>
    %261 = arith.addf %252, %260 : vector<8x128xf32>
    %cst_39 = arith.constant 3.000000e+00 : f32
    %262 = vector.broadcast %cst_39 : f32 to vector<1x128xf32>
    %263 = arith.cmpf oeq, %74, %262 : vector<1x128xf32>
    %264 = arith.extui %263 : vector<1x128xi1> to vector<1x128xi32>
    %265 = arith.sitofp %264 : vector<1x128xi32> to vector<1x128xf32>
    %266 = vector.extract_strided_slice %73 {offsets = [0, 3], sizes = [8, 1], strides = [1, 1]} : vector<8x4xf32> to vector<8x1xf32>
    %267 = vector.broadcast %265 : vector<1x128xf32> to vector<8x128xf32>
    %268 = vector.broadcast %266 : vector<8x1xf32> to vector<8x128xf32>
    %269 = arith.mulf %267, %268 : vector<8x128xf32>
    %270 = arith.addf %261, %269 : vector<8x128xf32>
    %c0_40 = arith.constant 0 : index
    %c0_41 = arith.constant 0 : index
    %c0_42 = arith.constant 0 : index
    %271 = vector.load %arg5[%c0_40, %c0_41, %c0_42] : memref<1x8x128xf32, #tpu.memory_space<vmem>>, vector<1x8x128xf32>
    %272 = vector.shape_cast %271 : vector<1x8x128xf32> to vector<8x128xf32>
    %273 = vector.shape_cast %270 : vector<8x128xf32> to vector<1x8x128xf32>
    tpu.vector_store %arg5[%c0_40, %c0_41, %c0_42], %273 {strides = array<i32>} : memref<1x8x128xf32, #tpu.memory_space<vmem>>, vector<1x8x128xf32>,
    return
  }
  func.func @transform_0(%arg0: i32, %arg1: i32, %arg2: i32) -> (i32, i32, i32) {
    %c0_i32 = arith.constant 0 : i32
    %c0_i32_0 = arith.constant 0 : i32
    return %arg0, %arg1, %c0_i32 : i32, i32, i32
  }
  func.func @transform_1(%arg0: i32, %arg1: i32, %arg2: i32) -> (i32, i32, i32) {
    %c0_i32 = arith.constant 0 : i32
    %c0_i32_0 = arith.constant 0 : i32
    return %arg0, %c0_i32, %arg2 : i32, i32, i32
  }
  func.func @transform_2(%arg0: i32, %arg1: i32, %arg2: i32) -> (i32, i32, i32) {
    %c0_i32 = arith.constant 0 : i32
    return %arg0, %arg1, %arg2 : i32, i32, i32
  }
}

</mosaic_0001>

<bundles_post_ra>
// kernel: pairwise_combined_cost.1
= control target key start
LH: loop header
LB: loop body
LE: loop exit
PB: predicated region body
PF: predicated region fallthrough
CT: control target
= control target key end

     0   :  { %7 = vsyncpa [#allocation3], 0  ;;  %s1728_s0 = inlined_call_operand.vmem [shape: f32[2,8,11], index: 0, kind: input, shape index: {}]   ;;  %s1729_s1 = inlined_call_operand.vmem [shape: f32[2,9,128], index: 1, kind: input, shape index: {}]   ;;  %s1730_s2 = inlined_call_operand.hbm [shape: f32[2,8,128], index: 2, kind: output, shape index: {}]  }
   0x1   :  { %9 = vsyncpa [#allocation3 + $0x1], 0  ;;  %s1341_s9 = smov 0   ;;  %s1343_s10 = smov 0  }
   0x2   :  { %s1345_s11 = smov 0   ;;  %s1347_s12 = smov 0  }
   0x3   :  { %s1349_s13 = smov 0   ;;  %s1351_s14 = smov 0  }
   0x4 LB: > { %s1060_s15 = sadd.s32 4294967295, %s1301_s14   ;;  %s1061_s16 = sadd.s32 4294967294, %s1301_s14   ;;  %s1301_s14 = sphi %s1351_s14, %s15_s14   ;;  %s1297_s13 = sphi %s1349_s13, %s1739_s13   ;;  %s1293_s12 = sphi %s1347_s12, %s1738_s12   ;;  %s1289_s11 = sphi %s1345_s11, %s1737_s11   ;;  %s1285_s10 = sphi %s1343_s10, %s1736_s10   ;;  %s1281_s9 = sphi %s1341_s9, %s1735_s9  }
   0x5   : > { %s34_s17 = sadd.s32 1, %s1297_s13  ;;  %s101_s18 = sadd.s32 1, %s1289_s11 }
   0x6   : > { %p36_p0 = scmp.ge.s32.totalorder %s34_s17, 2  ;;  %p111_p1 = scmp.ne.s32.totalorder %s1289_s11, %s1285_s10 }
   0x7   : > { %p112_p2 = scmp.eq.s32.totalorder %s1060_s15, 1  ;;  %p117_p3 = scmp.ne.s32.totalorder %s1285_s10, %s1281_s9 }
   0x8   : > { %s1741_s17 = smov (%p36_p0, %s34_s17), 0  ;;  %p118_p5 = scmp.eq.s32.totalorder %s1061_s16, 1 }
   0x9   : > { %p1381_p4 = por %p112_p2, %p111_p1  ;;  %s94_s20 = ssub.s32 %s1297_s13, %s1741_s17 }
   0xa   : > { %p1064_p6 = scmp.ge.s32.totalorder %s1301_s14, 1  ;;  %p99_p7 = scmp.eq.s32.totalorder %s94_s20, 0 }
   0xb   : > { %p1388_p8 = por %p118_p5, %p117_p3  ;;  %p157_p9 = scmp.lt.s32.totalorder %s1301_s14, 3 }
   0xc   : > { %s1394_s22 = scalar_select %p99_p7, %s1289_s11, %s101_s18  }
   0xd   : > { %p158_p10 = pnand %p1064_p6, %p157_p9 }
   0xe   : > { %p189_p11 = scmp.lt.s32.totalorder (!%p158_p10), %s1293_s12, 1  ;;  %vm650_vm0 = vcmask (!%p158_p10), 89144   ;;  %s1303_s28 = smov (!%p158_p10), 125   ;;  %v1306_v6 = vmov (!%p158_p10), 0   ;;  %v1307_v7 = vmov (!%p158_p10), 3   ;;  %v1314_v40 = vmov (!%p158_p10), 1  }
   0xf   : > { %161 = sbr.rel (%p158_p10) target bundleno = 614 (0x266), region = 28  ;;  %s1304_s29 = smov (!%p158_p10), 127   ;;  %1179 = vset.pattern.permute.xlu0 (!%p158_p10), %v1306_v6  ;;  %1181 = vset.pattern.permute.xlu1 (!%p158_p10), %v1307_v7  ;;  %v1309_v20 = vmov (!%p158_p10), 2102212464   ;;  %v1310_v24 = vmov (!%p158_p10), 683565275  }
  0x10   : > { %s1305_s30 = smov (!%p158_p10), 126   ;;  %s1308_s3 = smov (!%p158_p10), 121   ;;  %v1311_v26 = vmov (!%p158_p10), 2475754826   ;;  %v1312_v29 = vmov (!%p158_p10), 2131351028  }
  0x11   : > { %v1313_v35 = vmov (!%p158_p10), 920167782   ;;  %v1315_v42 = vmov (!%p158_p10), 1326507024   ;;  %s186_s8 = sand.u32 (!%p158_p10), 1, %s1285_s10   ;;  %s1090_s16 = sshll.u32 (!%p158_p10), %s1293_s12, 7 }
  0x12   : > { %s1065_s15 = sshll.u32 (!%p158_p10), %s186_s8, 3  ;;  %s1681_s25 = scalar_lea.hbm (!%p158_p10), %s1730_s2, %s1090_s16 }
  0x13   : > { %s188_s18 = scalar_lea.vmem (!%p158_p10), [#allocation2], %s1065_s15  ;;  %s952_s26 = scalar_lea.sflag (!%p158_p10), [#allocation3], %s186_s8 }
  0x14   : > { %s967_s20 = sshll.u32 (!%p158_p10), %s188_s18, 4  ;;  %s1683_s20 = int_to_ptr.vmem [resolvable:$true] %s967_s20 }
  0x16   : > { %s1398_s23 = scalar_select %p189_p11, %s1293_s12, 1 }
  0x17   : > { %s1325_s12 = smov [#allocation2]  }
  0x18   : > { %s1066_s24 = sshll.u32 %s1398_s23, 3  ;;  %s1093_s4 = sshll.u32 %s1398_s23, 4 }
  0x19   : > { %s195_s27 = scalar_lea.vmem %s1728_s0, %s1066_s24  ;;  %s1493_s7 = scalar_lea.vmem %s1729_s1, %s1093_s4 }
  0x1a   : > { %v1404_v0 = vld [vmem:[%s195_s27] sm:$0xff]  ;;  %s1223_s27 = scalar_lea.vmem %s1683_s20, 128 }
  0x1b   : > { %v651_v1 = vsel %vm650_vm0, %v1404_v0, -inf  ;;  %v207_v2 = vmul.f32 0.5, %v1404_v0  ;;  %v239_v8 = vand.u32 2139095040, %v1404_v0  ;;  %v236_v19 = vand.u32 2147483647, %v1404_v0  ;;  %p1224_p12 = scmp.ne.s32.totalorder %s1683_s20, %s1223_s27 }
  0x1c   : > { %652 = vmax.xlane.f32.xlu0 %v651_v1  ;;  %v1448_v56 = vadd.f32 1e-07, %v1404_v0  ;;  %v1316_v1 = vmov 4   ;;  %vm238_vm8 = vcmp.lt.s32.totalorder %v1404_v0, 0  ;;  %vm328_vm0 = vweird.f32 %v1404_v0 }
  0x1d   : > { %209 = vrot.lane.b32.xlu1 %v207_v2, %s1303_s28  ;;  %v240_v9 = vshrl.u32 %v239_v8, 23  ;;  %v243_v22 = vand.u32 8388607, %v236_v19  ;;  %vm237_vm9 = vcmp.le.f32.partialorder %v236_v19, 0.7853982  ;;  %p1225_p13 = pnand %p1224_p12, %p1381_p4  ;;  %s1227_s28 = sshll.u32 %s1325_s12, 4  ;;  %s1228_s28 = int_to_ptr.vmem [resolvable:$false] %s1227_s28 }
  0x1e   : > { %p1230_p1 = scmp.lt.s32.totalorder %s1683_s20, %s1228_s28 }
  0x1f   : > { %v1069_v11 = vadd.s32 4294967169, %v240_v9  ;;  %v244_v33 = vor.u32 8388608, %v243_v22  ;;  %p1226_p0 = pneg %p1225_p13 }
  0x21   : > { %221 = vrot.lane.b32.xlu1 %v1404_v0, %s1304_s29  ;;  %v246_v13 = vadd.s32 1, %v1069_v11  ;;  %v284_v46 = vshll.u32 %v244_v33, 8  ;;  %v1318_v11 = vmov 5   ;;  %s1229_s29 = scalar_lea.vmem %s1228_s28, 256 }
  0x22   : > { %p1231_p2 = scmp.lt.s32.totalorder %s1229_s29, %s1223_s27 }
  0x23   : > { %vm247_vm1 = vcmp.gt.s32.totalorder %v246_v13, 0 }
  0x24   : > { %v248_v15 = vsel %vm247_vm1, %v246_v13, 0  ;;  %vm661_vm1 = vcmask 31744   ;;  %p1232_p3 = por %p1231_p2, %p1230_p1 }
  0x25   : > { %225 = vrot.lane.b32.xlu1 %v1404_v0, %s1305_s30  ;;  %v250_v16 = vand.u32 31, %v248_v15  ;;  %v249_v23 = vshrl.u32 %v248_v15, 5 }
  0x26   : > { %p1233_p5 = pnand %p1232_p3, %p1226_p0 }
  0x27   : > { %v251_v18 = vsub.s32 32, %v250_v16  ;;  %v262_v21 = vshll.u32 %v1309_v20, %v250_v16  ;;  %v253_v25 = vshll.u32 %v1310_v24, %v250_v16  ;;  %v256_v28 = vshll.u32 %v1311_v26, %v250_v16 }
  0x28   : > { %v259_v31 = vshll.u32 %v1312_v29, %v250_v16  ;;  %v265_v39 = vshll.u32 %v1313_v35, %v250_v16  ;;  %vm268_vm2 = vcmp.lt.s32.totalorder %v249_v23, 1  ;;  %vm269_vm3 = vcmp.lt.s32.totalorder %v249_v23, 2 }
  0x29   : > { %v254_v27 = vshrl.u32 %v1311_v26, %v251_v18  ;;  %v257_v30 = vshrl.u32 %v1312_v29, %v251_v18  ;;  %v260_v32 = vshrl.u32 %v1309_v20, %v251_v18  ;;  %v263_v36 = vshrl.u32 %v1313_v35, %v251_v18 }
  0x2a   : > { %v266_v43 = vshrl.u32 %v1315_v42, %v251_v18  ;;  %vm270_vm4 = vcmp.lt.s32.totalorder %v249_v23, 3  ;;  %vm271_vm5 = vcmp.lt.s32.totalorder %v249_v23, 4  ;;  %v252_v47 = vshrl.u32 %v1310_v24, %v251_v18 }
  0x2b   : > { %v255_v34 = vor.u32 %v254_v27, %v253_v25  ;;  %v258_v37 = vor.u32 %v257_v30, %v256_v28  ;;  %v261_v38 = vor.u32 %v260_v32, %v259_v31  ;;  %v264_v41 = vor.u32 %v263_v36, %v262_v21 }
  0x2c   : > { %v267_v48 = vor.u32 %v266_v43, %v265_v39  ;;  %v1319_v25 = vmov 6  }
  0x2d   : > { %v276_v44 = vsel %vm268_vm2, %v255_v34, %v258_v37  ;;  %v277_v45 = vsel %vm271_vm5, %v264_v41, 920167782  ;;  %v273_v50 = vsel %vm271_vm5, %v261_v38, 2102212464  ;;  %v280_v52 = vsel %vm268_vm2, %v258_v37, %v261_v38 }
  0x2e   : > { %v278_v49 = vsel %vm270_vm4, %v261_v38, %v277_v45  ;;  %v272_v53 = vsel %vm268_vm2, %v252_v47, %v255_v34  ;;  %v274_v54 = vsel %vm270_vm4, %v258_v37, %v273_v50  ;;  %v281_v55 = vsel %vm271_vm5, %v267_v48, 1326507024 }
  0x2f   : > { %v279_v51 = vsel %vm269_vm3, %v276_v44, %v278_v49  ;;  %v282_v57 = vsel %vm270_vm4, %v264_v41, %v281_v55  ;;  %v275_v60 = vsel %vm269_vm3, %v272_v53, %v274_v54 }
  0x30   : > { %v1451_v58 = vmul.u32.u64.low %v284_v46, %v279_v51  ;;  %v1452_v59 = vmul.u32.u64.high %v284_v46, %v279_v51, %v1451_v58  ;;  %v283_v61 = vsel %vm269_vm3, %v280_v52, %v282_v57  ;;  %v291_v2 = vmul.u32 %v284_v46, %v275_v60 }
  0x31   : > { %v1456_v62 = vmul.u32.u64.low %v284_v46, %v283_v61  ;;  %v1457_v63 = vmul.u32.u64.high %v284_v46, %v283_v61, %v1456_v62 }
  0x33   : > { %vm293_vm6 = vc.u32 %v1457_v63, %v1451_v58 }
  0x8f   : > { %v210_v10 = vpop.permute.xlu1 %209 }
  0x90   : > { %v1418_v14 = vadd.f32 %v210_v10, %v1404_v0  ;;  %v1421_v17 = vsub.f32 %v1404_v0, %v210_v10 }
  0xa9   : > { %v653_v3 = vpop.xlane.xlu0 %652 }
  0xaa   : > { %v654_v4 = vsub.f32 %v1404_v0, %v653_v3  ;;  %v294_v3 = vadd.s32 1, %v1452_v59 }
  0xac   : > { %v655_v5 = vmul.f32 1.442695, %v654_v4  ;;  %v295_v4 = vsel %vm293_vm6, %v294_v3, %v1452_v59  ;;  %v1320_v3 = vmov 9  }
  0xad   : > { %v296_v8 = vadd.s32 %v295_v4, %v291_v2 }
  0xae   : > { %1199 = vpow2.f32 %v655_v5  ;;  %v1317_v5 = vmov 2  }
  0xaf   : > { %v297_v9 = vadd.s32 536870912, %v296_v8 }
  0xb1   : > { %v298_v10 = vshrl.u32 %v297_v9, 30 }
  0xb3   : > { %v299_v13 = vshll.u32 %v298_v10, 30  ;;  %v322_v39 = vsub.s32 4, %v298_v10 }
  0xb5   : > { %v300_v15 = vsub.s32 %v296_v8, %v299_v13  ;;  %v323_v43 = vsel %vm238_vm8, %v322_v39, %v298_v10 }
  0xb6   : > { %v325_v46 = vsel %vm237_vm9, 0, %v323_v43 }
  0xb7   : > { %v302_v16 = vsub.s32 0, %v300_v15  ;;  %v432_v47 = vadd.s32 3, %v325_v46  ;;  %v329_v49 = vand.u32 3, %v325_v46 }
  0xb8   : > { %v1414_v12 = vpop.eup %1199 }
  0xb9   : > { %658 = vrot.lane.b32.xlu0 %v1414_v12, %s1308_s3  ;;  %v1070_v18 = vmin.u32 %v302_v16, %v300_v15  ;;  %v433_v48 = vand.u32 3, %v432_v47  ;;  %vm334_vm11 = vcmp.eq.s32.totalorder %v329_v49, 2  ;;  %vm331_vm13 = vcmp.eq.s32.totalorder %v329_v49, 0 }
  0xba   : > { %vm330_vm15 = vcmp.lt.s32.totalorder %v329_v49, 2 }
  0xbb   : > { %v304_v21 = vclz %v1070_v18  ;;  %vm438_vm10 = vcmp.eq.s32.totalorder %v433_v48, 2  ;;  %vm435_vm12 = vcmp.eq.s32.totalorder %v433_v48, 0  ;;  %vm434_vm14 = vcmp.lt.s32.totalorder %v433_v48, 2 }
  0xbd   : > { %670 = vperm.xlu0 %1179, %v1418_v14   ;;  %v1071_v22 = vadd.s32 4294967294, %v304_v21 }
  0xbf   : > { %vm1072_vm7 = vcmp.lt.s32.totalorder %v1071_v22, 0 }
  0xc0   : > { %v307_v23 = vsel %vm1072_vm7, 0, %v1071_v22 }
  0xc1   : > { %680 = vperm.xlu0 %1179, %v1421_v17   ;;  %v308_v27 = vsub.s32 32, %v307_v23  ;;  %v309_v28 = vshll.u32 %v300_v15, %v307_v23  ;;  %v312_v30 = vsub.s32 4294967266, %v307_v23 }
  0xc3   : > { %v313_v32 = vadd.s32 127, %v312_v30 }
  0xc5   : > { %1180 = vset.pattern.permute.xlu0 %v1314_v40  ;;  %v314_v34 = vshll.u32 %v313_v32, 23 }
  0xc6   : > { %727 = vperm.xlu0 %1180, %v1418_v14  }
  0xc7   : > { %v315_v36 = vor.u32 4788187, %v314_v34 }
  0xc9   : > { %v316_v38 = vand.u32 2147483647, %v315_v36 }
  0xca   : > { %736 = vperm.xlu0 %1180, %v1421_v17  }
  0xce   : > { %1182 = vset.pattern.permute.xlu0 %v1316_v1 }
  0xcf   : > { %777 = vperm.xlu0 %1182, %v1448_v56  }
  0xd3   : > { %1183 = vset.pattern.permute.xlu0 %v1317_v5 }
  0xd4   : > { %786 = vperm.xlu0 %1183, %v1418_v14   ;;  %v292_v14 = vadd.s32 %v1451_v58, %v1457_v63 }
  0xd6   : > { %v310_v31 = vshrl.u32 %v292_v14, %v308_v27 }
  0xd8   : > { %1185 = vset.pattern.permute.xlu0 %v1318_v11  ;;  %v311_v33 = vor.u32 %v310_v31, %v309_v28 }
  0xd9   : > { %836 = vperm.xlu0 %1185, %v1448_v56  }
  0xda   : > { %v318_v37 = vcvt.s32.f32 %v311_v33 }
  0xdd   : > { %1187 = vset.pattern.permute.xlu0 %v1316_v1  ;;  %v222_v1 = vpop.permute.xlu1 %221 }
  0xde   : > { %764 = vperm.xlu0 %1187, %v1404_v0   ;;  %v224_v2 = vmul.f32 %v222_v1, %v1404_v0 }
  0xe1   : > { %v226_v4 = vpop.permute.xlu1 %225 }
  0xe2   : > { %1190 = vset.pattern.permute.xlu0 %v1314_v40  ;;  %v319_v40 = vmul.f32 %v318_v37, %v316_v38  ;;  %v228_v8 = vmul.f32 %v226_v4, %v224_v2 }
  0xe3   : > { %753 = vperm.xlu0 %1190, %v1404_v0  }
  0xe4   : > { %v320_v41 = vxor.u32 2147483648, %v319_v40  ;;  %v845_v9 = vadd.f32 1e-07, %v228_v8 }
  0xe6   : > { %v321_v44 = vsel %vm238_vm8, %v320_v41, %v319_v40 }
  0xe7   : > { %1193 = vset.pattern.permute.xlu0 %v1319_v25  ;;  %v324_v45 = vsel %vm237_vm9, %v1404_v0, %v321_v44 }
  0xe8   : > { %1201 = vcosq.f32 %v324_v45 }
  0xe9   : > { %1203 = vsinq.f32 %v324_v45 }
  0xf2   : > { %v1202_v50 = vpop.eup %1201 }
  0xf3   : > { %v1204_v51 = vpop.eup %1203  ;;  %v335_v52 = vxor.u32 2147483648, %v1202_v50 }
  0xf4   : > { %v332_v53 = vxor.u32 2147483648, %v1204_v51 }
  0xf5   : > { %v440_v19 = vsel %vm438_vm10, %v335_v52, %v1204_v51  ;;  %v336_v54 = vsel %vm334_vm11, %v335_v52, %v1204_v51 }
  0xf6   : > { %v437_v55 = vsel %vm435_vm12, %v1202_v50, %v332_v53  ;;  %v333_v57 = vsel %vm331_vm13, %v1202_v50, %v332_v53 }
  0xf7   : > { %v441_v58 = vsel %vm434_vm14, %v437_v55, %v440_v19  ;;  %v337_v59 = vsel %vm330_vm15, %v333_v57, %v336_v54 }
  0xf8   : > { %v442_v60 = vsel %vm328_vm0, nan, %v441_v58  ;;  %v338_v61 = vsel %vm328_vm0, nan, %v337_v59  ;;  %v1322_v59 = vmov 8  }
  0xf9   : > { %882 = vperm.xlu0 %1193, %v442_v60  }
  0xfd   : > { %1196 = vset.pattern.permute.xlu0 %v1320_v3 }
 0x12b   : > { %v659_v62 = vpop.permute.xlu0 %658 }
 0x12c   : > { %v662_v63 = vsel %vm661_vm1, %v659_v62, 0.0 }
 0x12d   : > { %663 = vadd.xlane.f32.xlu1 %v662_v63 }
 0x13c   : > { %v1539_v1 = vpop.permute.xlu0 %670 }
 0x13e   : > { %719 = vperm.xlu1 %1181, %v1448_v56  }
 0x140   : > { %v1542_v3 = vpop.permute.xlu0 %680 }
 0x142   : > { %1184 = vset.pattern.permute.xlu1 %v1317_v5 }
 0x143   : > { %795 = vperm.xlu1 %1184, %v1421_v17   ;;  %v1321_v17 = vmov 7  }
 0x147   : > { %1186 = vset.pattern.permute.xlu1 %v1307_v7  ;;  %v1496_v7 = vld [vmem:[%s1493_s7] sm:$0xff] }
 0x148   : > { %848 = vperm.xlu1 %1186, %v845_v9   ;;  %v443_v18 = vand.u32 2147483647, %v1496_v7  ;;  %v1547_v9 = vpop.permute.xlu0 %727  ;;  %vm445_vm9 = vcmp.lt.s32.totalorder %v1496_v7, 0  ;;  %vm535_vm1 = vweird.f32 %v1496_v7 }
 0x14a   : > { %v450_v33 = vand.u32 8388607, %v443_v18  ;;  %vm1636_vm10 = vcmp.le.f32.partialorder %v443_v18, 0.7853982 }
 0x14c   : > { %705 = vperm.xlu1 %1186, %v1404_v0   ;;  %v451_v38 = vor.u32 8388608, %v450_v33 }
 0x14e   : > { %v491_v43 = vshll.u32 %v451_v38, 8 }
 0x150   : > { %1188 = vset.pattern.permute.xlu1 %v1318_v11 }
 0x151   : > { %823 = vperm.xlu1 %1188, %v1404_v0  }
 0x155   : > { %1189 = vset.pattern.permute.xlu1 %v1306_v6  ;;  %v446_v6 = vand.u32 2139095040, %v1496_v7 }
 0x156   : > { %695 = vperm.xlu1 %1189, %v1404_v0  }
 0x157   : > { %v447_v56 = vshrl.u32 %v446_v6, 23  ;;  %v673_v6 = vlaneseq }
 0x15a   : > { %1191 = vset.pattern.permute.xlu1 %v1317_v5  ;;  %v1077_v5 = vadd.s32 4294967169, %v447_v56 }
 0x15b   : > { %812 = vperm.xlu1 %1191, %v1404_v0  }
 0x15c   : > { %v453_v10 = vadd.s32 1, %v1077_v5 }
 0x15e   : > { %vm454_vm2 = vcmp.gt.s32.totalorder %v453_v10, 0 }
 0x15f   : > { %1192 = vset.pattern.permute.xlu1 %v1319_v25  ;;  %v455_v0 = vsel %vm454_vm2, %v453_v10, 0  ;;  %v1551_v10 = vshrl.u32 %v673_v6, 7 }
 0x160   : > { %872 = vperm.xlu1 %1192, %v338_v61   ;;  %v457_v11 = vand.u32 31, %v455_v0  ;;  %v456_v21 = vshrl.u32 %v455_v0, 5  ;;  %v1553_v0 = vpop.permute.xlu0 %736 }
 0x161   : > { %v710_v33 = vsub.s32 4, %v1551_v10 }
 0x162   : > { %v458_v13 = vsub.s32 32, %v457_v11  ;;  %v469_v15 = vshll.u32 %v1309_v20, %v457_v11  ;;  %v472_v22 = vshll.u32 %v1313_v35, %v457_v11  ;;  %v460_v23 = vshll.u32 %v1310_v24, %v457_v11 }
 0x163   : > { %v463_v27 = vshll.u32 %v1311_v26, %v457_v11  ;;  %v466_v30 = vshll.u32 %v1312_v29, %v457_v11  ;;  %vm478_vm3 = vcmp.lt.s32.totalorder %v456_v21, 4  ;;  %vm475_vm4 = vcmp.lt.s32.totalorder %v456_v21, 1 }
 0x164   : > { %1194 = vset.pattern.permute.xlu1 %v1321_v17  ;;  %v470_v16 = vshrl.u32 %v1313_v35, %v458_v13  ;;  %v473_v14 = vshrl.u32 %v1315_v42, %v458_v13  ;;  %v461_v25 = vshrl.u32 %v1311_v26, %v458_v13  ;;  %v464_v28 = vshrl.u32 %v1312_v29, %v458_v13 }
 0x165   : > { %v467_v31 = vshrl.u32 %v1309_v20, %v458_v13  ;;  %vm477_vm5 = vcmp.lt.s32.totalorder %v456_v21, 3  ;;  %vm476_vm6 = vcmp.lt.s32.totalorder %v456_v21, 2  ;;  %v459_v48 = vshrl.u32 %v1310_v24, %v458_v13 }
 0x166   : > { %v471_v32 = vor.u32 %v470_v16, %v469_v15  ;;  %v474_v34 = vor.u32 %v473_v14, %v472_v22  ;;  %v462_v35 = vor.u32 %v461_v25, %v460_v23  ;;  %v465_v42 = vor.u32 %v464_v28, %v463_v27  ;;  %v778_v14 = vpop.permute.xlu0 %777 }
 0x167   : > { %v468_v36 = vor.u32 %v467_v31, %v466_v30  ;;  %v214_v17 = vmul.f32 0.5, %v1496_v7  ;;  %v1557_v15 = vsub.s32 1, %v1551_v10  ;;  %v1561_v21 = vsub.s32 2, %v1551_v10 }
 0x168   : > { %v484_v37 = vsel %vm478_vm3, %v471_v32, 920167782  ;;  %v488_v39 = vsel %vm478_vm3, %v474_v34, 1326507024  ;;  %v483_v20 = vsel %vm475_vm4, %v462_v35, %v465_v42  ;;  %v479_v19 = vsel %vm475_vm4, %v459_v48, %v462_v35 }
 0x169   : > { %v485_v29 = vsel %vm477_vm5, %v468_v36, %v484_v37  ;;  %v487_v40 = vsel %vm475_vm4, %v465_v42, %v468_v36  ;;  %v489_v41 = vsel %vm477_vm5, %v471_v32, %v488_v39  ;;  %v480_v51 = vsel %vm478_vm3, %v468_v36, 2102212464 }
 0x16a   : > { %v486_v44 = vsel %vm476_vm6, %v483_v20, %v485_v29  ;;  %v490_v45 = vsel %vm476_vm6, %v487_v40, %v489_v41  ;;  %v481_v54 = vsel %vm477_vm5, %v465_v42, %v480_v51  ;;  %v216_v5 = vrot.slane %v214_v17, 3  ;;  %v1589_v38 = vpop.permute.xlu0 %786 }
 0x16b   : > { %v1520_v46 = vmul.u32.u64.low %v491_v43, %v486_v44  ;;  %v1521_v47 = vmul.u32.u64.high %v491_v43, %v486_v44, %v1520_v46  ;;  %v1525_v49 = vmul.u32.u64.low %v491_v43, %v490_v45  ;;  %v1526_v50 = vmul.u32.u64.high %v491_v43, %v490_v45, %v1525_v49 }
 0x16c   : > { %v482_v57 = vsel %vm476_vm6, %v479_v19, %v481_v54  ;;  %v219_v13 = vadd.f32 %v216_v5, %v1496_v7  ;;  %v218_v16 = vsub.f32 %v1496_v7, %v216_v5  ;;  %v769_v30 = vsub.s32 5, %v1551_v10 }
 0x16d   : > { %v501_v58 = vadd.s32 1, %v1521_v47  ;;  %vm500_vm7 = vc.u32 %v1526_v50, %v1520_v46  ;;  %v498_v24 = vmul.u32 %v491_v43, %v482_v57  ;;  %v1577_v32 = vsub.s32 3, %v1551_v10 }
 0x16e   : > { %v1564_v23 = vrot.slane %v219_v13, %v1557_v15  ;;  %v1567_v25 = vrot.slane %v218_v16, %v1557_v15  ;;  %v1570_v27 = vrot.slane %v219_v13, %v1561_v21  ;;  %v1573_v28 = vrot.slane %v218_v16, %v1561_v21  ;;  %v837_v57 = vpop.permute.xlu0 %836 }
 0x16f   : > { %v502_v60 = vsel %vm500_vm7, %v501_v58, %v1521_v47  ;;  %v1592_v39 = vrot.slane %v219_v13, %v1577_v32  ;;  %v828_v20 = vsub.s32 6, %v1551_v10  ;;  %v230_v29 = vrot.slane %v1496_v7, 1 }
 0x170   : > { %v503_v61 = vadd.s32 %v502_v60, %v498_v24  ;;  %v677_v34 = vmin.f32 %v1539_v1, %v1564_v23  ;;  %v687_v42 = vmax.f32 %v1542_v3, %v1567_v25  ;;  %v734_v36 = vmin.f32 %v1547_v9, %v1570_v27 }
 0x171   : > { %v743_v37 = vmax.f32 %v1553_v0, %v1573_v28  ;;  %v711_v40 = vrot.slane %v1496_v7, %v710_v33  ;;  %v1598_v41 = vrot.slane %v218_v16, %v1577_v32  ;;  %v233_v49 = vrot.slane %v1496_v7, 2 }
 0x172   : > { %v504_v62 = vadd.s32 536870912, %v503_v61  ;;  %v688_v45 = vsub.f32 %v677_v34, %v687_v42  ;;  %v793_v51 = vmin.f32 %v1589_v38, %v1592_v39  ;;  %v499_v19 = vadd.s32 %v1520_v46, %v1526_v50  ;;  %v765_v16 = vpop.permute.xlu0 %764 }
 0x173   : > { %v744_v47 = vsub.f32 %v734_v36, %v743_v37 }
 0x174   : > { %v1537_v63 = vshrl.u32 %v504_v62, 30 }
 0x175   : > { %v745_v60 = vmax.f32 %v744_v47, 0.0  ;;  %v690_v47 = vmax.f32 %v1539_v1, %v1564_v23  ;;  %v806_v1 = vmax.f32 %v1589_v38, %v1592_v39 }
 0x176   : > { %v506_v2 = vshll.u32 %v1537_v63, 30 }
 0x178   : > { %v1544_v4 = vsub.s32 %v503_v61, %v506_v2 }
 0x17a   : > { %v509_v8 = vsub.s32 0, %v1544_v4 }
 0x17c   : > { %v1078_v56 = vmin.u32 %v509_v8, %v1544_v4 }
 0x17e   : > { %v511_v11 = vclz %v1078_v56 }
 0x180   : > { %v1079_v22 = vadd.s32 4294967294, %v511_v11 }
 0x182   : > { %vm1080_vm8 = vcmp.lt.s32.totalorder %v1079_v22, 0 }
 0x183   : > { %v514_v35 = vsel %vm1080_vm8, 0, %v1079_v22 }
 0x184   : > { %v519_v44 = vsub.s32 4294967266, %v514_v35  ;;  %v515_v58 = vsub.s32 32, %v514_v35  ;;  %v516_v2 = vshll.u32 %v1544_v4, %v514_v35 }
 0x186   : > { %v520_v24 = vadd.s32 127, %v519_v44  ;;  %v517_v17 = vshrl.u32 %v499_v19, %v515_v58 }
 0x188   : > { %v521_v6 = vshll.u32 %v520_v24, 23  ;;  %v518_v11 = vor.u32 %v517_v17, %v516_v2  ;;  %v759_v17 = vrot.slane %v1496_v7, %v1561_v21 }
 0x18a   : > { %v522_v13 = vor.u32 4788187, %v521_v6  ;;  %v754_v6 = vpop.permute.xlu0 %753 }
 0x1ba   : > { %v664_v26 = vpop.xlane.xlu1 %663 }
 0x1bb   : > { %1205 = vrcp.f32 %v664_v26  ;;  %v770_v26 = vrot.slane %v1496_v7, %v769_v30  ;;  %v523_v30 = vand.u32 2147483647, %v522_v13 }
 0x1bd   : > { %v780_v48 = vadd.f32 %v778_v14, %v770_v26  ;;  %v1614_v4 = vsub.f32 %v765_v16, %v770_v26  ;;  %v747_v26 = vmax.f32 %v1547_v9, %v1570_v27  ;;  %v529_v27 = vsub.s32 4, %v1537_v63 }
 0x1be   : > { %v720_v31 = vpop.permute.xlu1 %719 }
 0x1bf   : > { %v722_v54 = vadd.f32 %v720_v31, %v711_v40  ;;  %1207 = vrcp.f32 %v780_v48  ;;  %v525_v31 = vcvt.s32.f32 %v518_v11  ;;  %v748_v48 = vmin.f32 %v1553_v0, %v1573_v28 }
 0x1c0   : > { %v530_v18 = vsel %vm445_vm9, %v529_v27, %v1537_v63  ;;  %v701_v63 = vrot.slane %v1496_v7, %v1557_v15 }
 0x1c1   : > { %1209 = vrcp.f32 %v722_v54  ;;  %v749_v54 = vsub.f32 %v747_v26, %v748_v48  ;;  %v877_v26 = vsub.s32 7, %v1551_v10 }
 0x1c2   : > { %v1600_v43 = vpop.permute.xlu1 %795 }
 0x1c3   : > { %v750_v39 = vmul.f32 %v749_v54, %v749_v54 }
 0x1c5   : > { %v1206_v52 = vpop.eup %1205 }
 0x1c6   : > { %v666_v53 = vmul.f32 %v1206_v52, %v1414_v12  ;;  %v1323_v12 = vmov 10   ;;  %v829_v52 = vrot.slane %v1496_v7, %v828_v20  ;;  %v526_v20 = vmul.f32 %v525_v31, %v523_v30 }
 0x1c8   : > { %v667_v55 = vmul.f32 -1.0, %v666_v53  ;;  %v232_v53 = vmul.f32 %v230_v29, %v1496_v7  ;;  %v839_v61 = vadd.f32 %v837_v57, %v829_v52 }
 0x1c9   : > { %v1208_v34 = vpop.eup %1207 }
 0x1ca   : > { %932 = vperm.xlu0 %1196, %v667_v55   ;;  %906 = vperm.xlu1 %1194, %v667_v55   ;;  %v235_v62 = vmul.f32 %v233_v49, %v232_v53  ;;  %1211 = vrcp.f32 %v839_v61  ;;  %v782_v29 = vmul.f32 %v1208_v34, %v1614_v4  ;;  %v527_v49 = vxor.u32 2147483648, %v526_v20 }
 0x1cb   : > { %v1210_v35 = vpop.eup %1209 }
 0x1cc   : > { %v854_v50 = vrot.slane %v235_v62, %v710_v33  ;;  %v783_v53 = vmul.f32 %v782_v29, %v782_v29  ;;  %v528_v0 = vsel %vm445_vm9, %v527_v49, %v526_v20 }
 0x1cd   : > { %v531_v28 = vsel %vm1636_vm10, %v1496_v7, %v528_v0 }
 0x1ce   : > { %1195 = vset.pattern.permute.xlu1 %v1322_v59  ;;  %1198 = vset.pattern.permute.xlu0 %v1323_v12  ;;  %v689_v59 = vmax.f32 %v688_v45, 0.0 }
 0x1cf   : > { %919 = vperm.xlu1 %1195, %v667_v55  }
 0x1d0   : > { %v746_v46 = vmul.f32 %v745_v60, %v689_v59  ;;  %v532_v60 = vsel %vm1636_vm10, 0, %v530_v18 }
 0x1d3   : > { %1197 = vset.pattern.permute.xlu1 %v1323_v12  ;;  %v849_v12 = vpop.permute.xlu1 %848 }
 0x1d4   : > { %945 = vperm.xlu1 %1197, %v667_v55   ;;  %v802_v55 = vmax.f32 %v1600_v43, %v1598_v41  ;;  %v855_v14 = vadd.f32 %v854_v50, %v849_v12  ;;  %v1212_v45 = vpop.eup %1211 }
 0x1d6   : > { %v803_v8 = vsub.f32 %v793_v51, %v802_v55 }
 0x1d7   : > { %v706_v5 = vpop.permute.xlu1 %705 }
 0x1d8   : > { %v804_v56 = vmax.f32 %v803_v8, 0.0  ;;  %v1612_v42 = vsub.f32 %v706_v5, %v711_v40  ;;  %v691_v40 = vmin.f32 %v1542_v3, %v1567_v25  ;;  %v807_v3 = vmin.f32 %v1600_v43, %v1598_v41 }
 0x1d9   : > { %v639_v8 = vadd.s32 3, %v532_v60 }
 0x1da   : > { %v805_v22 = vmul.f32 %v804_v56, %v746_v46  ;;  %v724_v33 = vmul.f32 %v1210_v35, %v1612_v42  ;;  %v692_v19 = vsub.f32 %v690_v47, %v691_v40  ;;  %v808_v41 = vsub.f32 %v806_v1, %v807_v3 }
 0x1db   : > { %v824_v36 = vpop.permute.xlu1 %823  ;;  %v536_v56 = vand.u32 3, %v532_v60  ;;  %v640_v13 = vand.u32 3, %v639_v8  ;;  %v773_v40 = vand.u32 2147483647, %v1614_v4  ;;  %v714_v48 = vand.u32 2147483647, %v1612_v42 }
 0x1dc   : > { %v856_v37 = vsub.f32 %v855_v14, %v805_v22  ;;  %v1618_v44 = vsub.f32 %v824_v36, %v829_v52  ;;  %v725_v51 = vmul.f32 %v724_v33, %v724_v33  ;;  %v693_v38 = vmul.f32 %v692_v19, %v692_v19 }
 0x1dd   : > { %v809_v58 = vmul.f32 %v808_v41, %v808_v41  ;;  %v818_v14 = vrot.slane %v1496_v7, %v1577_v32  ;;  %vm538_vm11 = vcmp.eq.s32.totalorder %v536_v56, 0  ;;  %vm642_vm12 = vcmp.eq.s32.totalorder %v640_v13, 0 }
 0x1de   : > { %1213 = vrcp.f32 %v856_v37  ;;  %v841_v52 = vmul.f32 %v1212_v45, %v1618_v44  ;;  %v784_v23 = vadd.f32 %v783_v53, %v725_v51  ;;  %v751_v57 = vadd.f32 %v750_v39, %v693_v38 }
 0x1df   : > { %1215 = vcosq.f32 %v531_v28  ;;  %v696_v2 = vpop.permute.xlu1 %695  ;;  %vm645_vm13 = vcmp.eq.s32.totalorder %v640_v13, 2  ;;  %vm541_vm14 = vcmp.eq.s32.totalorder %v536_v56, 2  ;;  %vm641_vm15 = vcmp.lt.s32.totalorder %v640_v13, 2 }
 0x1e0   : > { %v842_v25 = vmul.f32 %v841_v52, %v841_v52  ;;  %1217 = vsinq.f32 %v531_v28  ;;  %v810_v12 = vadd.f32 %v809_v58, %v751_v57  ;;  %v702_v16 = vsub.f32 %v696_v2, %v701_v63  ;;  %v883_v28 = vpop.permute.xlu0 %882  ;;  %v206_v57 = vld [vmem:[%s1493_s7 + $0x8] sm:$0x1] }
 0x1e1   : > { %vm537_vm0 = vcmp.lt.s32.totalorder %v536_v56, 2  ;;  %vm897_vm2 = vcmp.eq.f32.partialorder %v206_v57, 0.0  ;;  %vm911_vm3 = vcmp.eq.f32.partialorder %v206_v57, 1.0  ;;  %vm924_vm4 = vcmp.eq.f32.partialorder %v206_v57, 2.0 }
 0x1e2   : > { %v843_v43 = vadd.f32 %v842_v25, %v784_v23  ;;  %v859_v50 = vadd.f32 1e-07, %v810_v12  ;;  %v703_v21 = vmul.f32 %v702_v16, %v702_v16  ;;  %v713_v49 = vand.u32 2147483647, %v702_v16 }
 0x1e3   : > { %v813_v30 = vpop.permute.xlu1 %812  ;;  %v832_v23 = vand.u32 2147483647, %v1618_v44  ;;  %v902_v44 = vsub.s32 0, %v1551_v10  ;;  %vm937_vm5 = vcmp.eq.f32.partialorder %v206_v57, 3.0 }
 0x1e4   : > { %v1651_v59 = vmul.f32 0.33333334, %v843_v43  ;;  %1219 = vrcp.f32 %v859_v50  ;;  %v819_v35 = vsub.f32 %v813_v30, %v818_v14  ;;  %v715_v3 = vadd.f32 %v714_v48, %v713_v49 }
 0x1e6   : > { %v863_v62 = vadd.f32 1e-07, %v1651_v59  ;;  %v820_v32 = vmul.f32 %v819_v35, %v819_v35  ;;  %v831_v25 = vand.u32 2147483647, %v819_v35 }
 0x1e7   : > { %v873_v42 = vpop.permute.xlu1 %872 }
 0x1e8   : > { %v1214_v55 = vpop.eup %1213  ;;  %v833_v43 = vadd.f32 %v832_v23, %v831_v25 }
 0x1e9   : > { %v1649_v24 = vmul.f32 %v1214_v55, %v805_v22  ;;  %v1216_v46 = vpop.eup %1215  ;;  %v760_v22 = vsub.f32 %v754_v6, %v759_v17 }
 0x1ea   : > { %v1218_v5 = vpop.eup %1217  ;;  %v542_v31 = vxor.u32 2147483648, %v1216_v46 }
 0x1eb   : > { %v862_v61 = vsub.f32 1.0, %v1649_v24  ;;  %v539_v15 = vxor.u32 2147483648, %v1218_v5  ;;  %v761_v34 = vmul.f32 %v760_v22, %v760_v22  ;;  %v772_v51 = vand.u32 2147483647, %v760_v22 }
 0x1ec   : > { %v647_v37 = vsel %vm645_vm13, %v542_v31, %v1218_v5  ;;  %v543_v33 = vsel %vm541_vm14, %v542_v31, %v1218_v5 }
 0x1ed   : > { %v864_v11 = vadd.f32 %v863_v62, %v862_v61  ;;  %v644_v36 = vsel %vm642_vm12, %v1216_v46, %v539_v15  ;;  %v540_v20 = vsel %vm538_vm11, %v1216_v46, %v539_v15  ;;  %v762_v29 = vadd.f32 %v761_v34, %v703_v21 }
 0x1ee   : > { %v648_v45 = vsel %vm641_vm15, %v644_v36, %v647_v37  ;;  %v544_v47 = vsel %vm537_vm0, %v540_v20, %v543_v33  ;;  %v1220_v53 = vpop.eup %1219  ;;  %v774_v9 = vadd.f32 %v773_v40, %v772_v51  ;;  %v1324_v62 = vmov 0.0  }
 0x1ef   : > { %1221 = vrcp.f32 %v864_v11  ;;  %v821_v52 = vadd.f32 %v820_v32, %v762_v29  ;;  %v649_v19 = vsel %vm535_vm1, nan, %v648_v45  ;;  %v545_v54 = vsel %vm535_vm1, nan, %v544_v47 }
 0x1f0   : > { %v888_v0 = vrot.slane %v649_v19, %v877_v26  ;;  %v878_v7 = vrot.slane %v545_v54, %v877_v26  ;;  %v775_v38 = vadd.f32 %v774_v9, %v715_v3  ;;  %v1085_v2 = vsel %vm897_vm2, 1.0, %v1324_v62 }
 0x1f1   : > { %v861_v27 = vmul.f32 %v1220_v53, %v821_v52  ;;  %v1086_v6 = vsel %vm911_vm3, 1.0, %v1324_v62  ;;  %v1087_v50 = vsel %vm924_vm4, 1.0, %v1324_v62  ;;  %v1088_v13 = vsel %vm937_vm5, 1.0, %v1324_v62 }
 0x1f2   : > { %v889_v39 = vmul.f32 %v888_v0, %v883_v28  ;;  %v879_v18 = vmul.f32 %v878_v7, %v873_v42  ;;  %v834_v58 = vadd.f32 %v833_v43, %v775_v38  ;;  %v917_v5 = vrot.slane %v1086_v6, %v902_v44 }
 0x1f3   : > { %v867_v55 = vadd.f32 %v862_v61, %v861_v27  ;;  %v930_v11 = vrot.slane %v1087_v50, %v902_v44  ;;  %v943_v15 = vrot.slane %v1088_v13, %v902_v44 }
 0x1f4   : > { %v890_v60 = vadd.f32 %v889_v39, %v879_v18  ;;  %v894_v8 = vmul.f32 0.8333333, %v834_v58 }
 0x1f6   : > { %v891_v63 = vsub.f32 1.0, %v890_v60 }
 0x1f8   : > { %v892_v24 = vmul.f32 0.5, %v891_v63 }
 0x1f9   : > { %v1222_v1 = vpop.eup %1221 }
 0x1fa   : > { %v866_v4 = vmul.f32 %v1222_v1, %v1651_v59 }
 0x1fc   : > { %v868_v41 = vmul.f32 %v866_v4, %v1651_v59  ;;  %v903_v59 = vrot.slane %v1085_v2, %v902_v44 }
 0x1fe   : > { %v869_v12 = vadd.f32 %v868_v41, %v867_v55 }
 0x200   : > { %v893_v17 = vmul.f32 2.0, %v869_v12 }
 0x202   : > { %v895_v61 = vadd.f32 %v894_v8, %v893_v17 }
 0x204   : > { %v896_v10 = vadd.f32 %v895_v61, %v892_v24 }
 0x249   : > { %v907_v46 = vpop.permute.xlu1 %906  ;;  %v933_v16 = vpop.permute.xlu0 %932 }
 0x24a   : > { %v909_v56 = vmul.f32 %v907_v46, %v903_v59  ;;  %v935_v31 = vmul.f32 %v933_v16, %v930_v11 }
 0x24c   : > { %v910_v14 = vadd.f32 %v909_v56, %v896_v10 }
 0x24e   : > { %v920_v22 = vpop.permute.xlu1 %919 }
 0x24f   : > { %v922_v30 = vmul.f32 %v920_v22, %v917_v5 }
 0x251   : > { %v923_v21 = vadd.f32 %v922_v30, %v910_v14 }
 0x253   : > { %v936_v34 = vadd.f32 %v935_v31, %v923_v21  ;;  %v946_v35 = vpop.permute.xlu1 %945 }
 0x254   : > { %v948_v36 = vmul.f32 %v946_v35, %v943_v15 }
 0x256   : > { %v949_v37 = vadd.f32 %v948_v36, %v936_v34 }
 0x258   : > { %950 = vst [vmem:[%s188_s18] sm:$0xff] %v949_v37 }
 0x259   : > { %1236 = shalt.err (!%p1233_p5)
}
 0x25a   : > { %s1237_s30 = scalar_lea.hbm %s1681_s25, 128  ;;  %s1241_s5 = scalar_lea.hbm %s1730_s2, 256 }
 0x25b   : > { %p1238_p6 = scmp.ne.s32.totalorder %s1681_s25, %s1237_s30  ;;  %p1242_p10 = scmp.lt.u32.totalorder %s1681_s25, %s1730_s2 }
 0x25c   : > { %p1243_p11 = scmp.lt.u32.totalorder %s1241_s5, %s1237_s30  ;;  %p1245_p13 = scmp.lt.u32.totalorder %s1237_s30, %s1681_s25 }
 0x25d   : > { %p1239_p7 = pnand %p1238_p6, %p1381_p4 }
 0x25e   : > { %p1244_p12 = por %p1243_p11, %p1242_p10 }
 0x25f   : > { %p1240_p9 = pneg %p1239_p7 }
 0x260   : > { %p1246_p0 = por %p1245_p13, %p1244_p12 }
 0x262   : > { %p1247_p1 = pnand %p1246_p0, %p1240_p9 }
 0x264   : > { %1250 = shalt.err (!%p1247_p1)
}
 0x265   : > { %1102 = dma.vmem_to_hbm [thread:$0]  (%p1381_p4), %s1683_s20, 128, %s1681_s25, %s952_s26  }
 0x266 PF: > { %p1108_p2 = scmp.ge.s32.totalorder %s1301_s14, 2  ;;  %s979_s8 = sand.u32 1, %s1281_s9  }
 0x267   : > { %s980_s15 = scalar_lea.sflag [#allocation3], %s979_s8 }
 0x268   : > { %p1105_p3 = pnand %p1108_p2, %p1388_p8 }
 0x26a   : > { %1276 = dma.done.wait (!%p1105_p3), %s980_s15, 128  }
 0x26b   : > { %1278 = vsyncadd (!%p1105_p3), %s980_s15, 4294967168  ;;  %s15_s14 = sadd.s32 1, %s1301_s14   ;;  %s1735_s9 = smov %s1285_s10 }
 0x26c   : > { %p12_p5 = scmp.ge.s32.totalorder %s15_s14, 4   ;;  %s1736_s10 = smov %s1289_s11 }
 0x26d   : > { %s1737_s11 = smov %s1394_s22  ;;  %s1738_s12 = smov %s1297_s13 }
 0x26e   : > { %s1739_s13 = smov %s1741_s17  ;;  %14 = sbr.rel (!%p12_p5) target bundleno = 4 (0x4), region = 66 }
 0x275   :  { %985 = vsyncpa [#allocation3], 1 }
 0x276   :  { %987 = vsyncpa [#allocation3 + $0x1], 1 }

</bundles_post_ra>
